<compile_context>
chip_gen: v7x
topology: tpu7x:2x2x1
jax: 0.10.0
libtpu: 0.0.40
codegen_flags: <defaults>
</compile_context>

<pallas_src>
import functools

import jax
import jax.numpy as jnp
from jax.experimental import pallas as pl
from jax.experimental.pallas import tpu as pltpu


def _transition_kernel(x_ref, w_ref, shift_ref, o_ref):
    """One grid step: one (batch, H-tile).

    x_ref:     (1, TH*W, Cin)          VMEM, compute dtype (bf16 default / f32)
    w_ref:     (Cin, Cout)             VMEM, conv1x1 weight with BN scale * 0.25 folded
    shift_ref: (1, Cout)               VMEM f32, BN shift * 0.25
    o_ref:     (1, TH//2, W//2, Cout)  VMEM, lane-dense NHWC output block
    """
    _, th_half, wo, cout = o_ref.shape
    W = 2 * wo
    rows, cin = x_ref.shape[1], x_ref.shape[2]

    # 1x1 conv == channel matmul on the MXU (f32 accumulation). The leading
    # size-1 squeeze is free; the block already arrives as a 2-D (rows, Cin) tile.
    x2d = x_ref[...].reshape(rows, cin)
    y = jnp.dot(x2d, w_ref[...], preferred_element_type=jnp.float32)   # (TH*W, Cout)

    # Folded BN shift + ReLU (scale and the 1/4 pool factor live in w/shift).
    y = jnp.maximum(y + shift_ref[...], 0.0)

    # 2x2 average pool, stride 2 (the /4 is pre-folded, so these are pure sums).
    # Pool H first: the pair index lands on a leading (untiled) dim, so this is
    # plain vreg adds and halves the data the sublane-pair W step must touch.
    y = y.reshape(th_half, 2, W, cout)
    y = y[:, 0] + y[:, 1]                                  # (TH/2, W, Cout)
    # Pool W: the pair index is the fast spatial axis -> sublane pair-sum.
    y = y.reshape(th_half, wo, 2, cout).sum(axis=2)        # (TH/2, W/2, Cout)

    o_ref[...] = y.reshape(o_ref.shape).astype(o_ref.dtype)


def _vmem_budget():
    """(per-tile estimate budget, scoped vmem limit) derived from this chip's VMEM."""
    cap = 64 << 20  # conservative fallback = v7x per-TensorCore VMEM
    try:
        cap = int(pltpu.get_tpu_info().vmem_capacity_bytes)
    except Exception:
        pass
    budget = int(cap * 0.40)                        # ~51 MiB on 128 MiB parts, ~25 MiB on v7x
    limit = min(cap * 3 // 4, cap - (16 << 20))     # ~96 MiB / 48 MiB scoped limit
    return budget, max(limit, 16 << 20)


def _pick_h_tile(N, H, W, Cin, Cout, in_itemsize, out_itemsize, budget_bytes):
    """Largest even H-tile dividing H whose per-step VMEM footprint fits the budget."""

    def footprint(th):
        x_blk = th * W * Cin * in_itemsize                   # input block
        o_blk = (th // 2) * (W // 2) * Cout * out_itemsize   # output block
        inter = th * W * Cout * 4                            # f32 matmul result
        inter += (th // 2) * W * Cout * 4                    # H-pooled f32
        inter += 2 * (th // 2) * (W // 2) * Cout * 4         # W-pool relayout + result
        wgt = Cin * Cout * in_itemsize + Cout * 4            # weight + shift
        # inputs/outputs and the (grid-constant) weight are double-buffered.
        return 2 * x_blk + 2 * o_blk + 2 * wgt + inter

    def ok(th):
        return (H % th == 0 and th % 2 == 0
                and (th == H or (th * W) % 8 == 0))  # keep input block sublane-aligned

    cands = [th for th in range(2, H + 1) if ok(th)]
    fits = [th for th in cands if footprint(th) <= budget_bytes]
    th = max(fits) if fits else min(cands)
    # v7x has two TensorCores: keep >=2 parallel grid points when H allows it.
    if N * (H // th) < 2 and H % 4 == 0 and ok(H // 2):
        th = H // 2
    return th


def transition_forward_nhwc(x_nhwc, conv_w, bn_gamma, bn_beta, bn_mean, bn_var,
                            *, eps=1e-5, compute_dtype="bfloat16",
                            out_dtype="float32"):
    """Forward pass (inference) on NHWC activations (preferred, transpose-free entry).

    Returns (N, H//2, W//2, Cout) in `out_dtype`.
    """
    N, H, W, Cin = x_nhwc.shape
    Cout = conv_w.shape[0]
    assert H % 2 == 0 and W % 2 == 0, "kernel assumes even spatial dims"

    cdt = jnp.dtype(compute_dtype)
    odt = jnp.dtype(out_dtype)

    # --- glue: fold BN (inference) and the 1/4 pooling factor into w / shift ---
    # (ReLU is positive-homogeneous, so the positive scale commutes through it.)
    scale = bn_gamma / jnp.sqrt(bn_var + eps)                              # (Cout,)
    w = (conv_w.reshape(Cout, Cin).T * (scale * 0.25)).astype(cdt)         # (Cin, Cout)
    shift = ((bn_beta - bn_mean * scale) * 0.25).reshape(1, Cout).astype(jnp.float32)

    # Flatten (H, W) -> H*W in HBM (free, row-major merge) so the kernel sees a
    # ready-made 2-D matmul operand, regardless of W's sublane-packing alignment.
    x = x_nhwc.astype(cdt).reshape(N, H * W, Cin)

    budget, vmem_limit = _vmem_budget()
    th = _pick_h_tile(N, H, W, Cin, Cout, cdt.itemsize, odt.itemsize, budget)
    Ho, Wo = H // 2, W // 2

    out = pl.pallas_call(
        _transition_kernel,
        out_shape=jax.ShapeDtypeStruct((N, Ho, Wo, Cout), odt),
        grid_spec=pltpu.PrefetchScalarGridSpec(
            num_scalar_prefetch=0,
            grid=(N, H // th),
            in_specs=[
                pl.BlockSpec((1, th * W, Cin), lambda n, h: (n, h, 0)),
                # w/shift are grid-constant: Pallas skips re-DMA of unchanged blocks,
                # but they are still double-buffered (counted in the tile estimate).
                pl.BlockSpec((Cin, Cout), lambda n, h: (0, 0)),
                pl.BlockSpec((1, Cout), lambda n, h: (0, 0)),
            ],
            out_specs=pl.BlockSpec((1, th // 2, Wo, Cout), lambda n, h: (n, h, 0, 0)),
        ),
        compiler_params=pltpu.CompilerParams(
            dimension_semantics=("parallel", "parallel"),
            vmem_limit_bytes=vmem_limit),
    )(x, w, shift)

    return out


@functools.partial(jax.jit,
                   static_argnames=("use_dropout", "compute_dtype", "out_dtype"))
def transition_forward(x_nchw, conv_w, bn_gamma, bn_beta, bn_mean, bn_var,
                       *, use_dropout=False, eps=1e-5,
                       compute_dtype="bfloat16", out_dtype="float32"):
    """Forward pass of `Transition` in inference mode (PyTorch NCHW layout).

    x_nchw : (N, Cin, H, W)    float32
    conv_w : (Cout, Cin, 1, 1) float32 (Conv2d weight, no bias)
    returns: (N, Cout, H//2, W//2) in `out_dtype`

    The two transposes below are HBM layout glue for PyTorch parity; for a
    memory-bound op they roughly double HBM traffic, so prefer
    `transition_forward_nhwc` when the surrounding model is NHWC.
    """
    del use_dropout  # eval mode: nn.Dropout is the identity
    x = jnp.transpose(x_nchw, (0, 2, 3, 1))
    out = transition_forward_nhwc(x, conv_w, bn_gamma, bn_beta, bn_mean, bn_var,
                                  eps=eps, compute_dtype=compute_dtype,
                                  out_dtype=out_dtype)
    return jnp.transpose(out, (0, 3, 1, 2))


def _reference(x_nchw, conv_w, bn_gamma, bn_beta, bn_mean, bn_var, eps=1e-5):
    """Pure-JAX reference (inference mode)."""
    N, Cin, H, W = x_nchw.shape
    Cout = conv_w.shape[0]
    x = jnp.transpose(x_nchw, (0, 2, 3, 1))
    y = jnp.einsum("nhwc,oc->nhwo", x, conv_w.reshape(Cout, Cin))
    y = (y - bn_mean) / jnp.sqrt(bn_var + eps) * bn_gamma + bn_beta
    y = jnp.maximum(y, 0.0)
    y = y.reshape(N, H // 2, 2, W // 2, 2, Cout).mean(axis=(2, 4))
    return jnp.transpose(y, (0, 3, 1, 2))


if __name__ == "__main__":
    key = jax.random.PRNGKey(0)
    k_x, k_w, k_g, k_b, k_m, k_v = jax.random.split(key, 6)

    N, Cin, Cout, H, W = 2, 4, 8, 16, 16

    x = jax.random.normal(k_x, (N, Cin, H, W), dtype=jnp.float32)
    bound = 1.0 / (Cin ** 0.5)
    conv_w = jax.random.uniform(k_w, (Cout, Cin, 1, 1), jnp.float32,
                                minval=-bound, maxval=bound)
    bn_gamma = 1.0 + 0.1 * jax.random.normal(k_g, (Cout,), jnp.float32)
    bn_beta = 0.1 * jax.random.normal(k_b, (Cout,), jnp.float32)
    bn_mean = 0.1 * jax.random.normal(k_m, (Cout,), jnp.float32)
    bn_var = jnp.abs(1.0 + 0.1 * jax.random.normal(k_v, (Cout,), jnp.float32))

    ref = _reference(x, conv_w, bn_gamma, bn_beta, bn_mean, bn_var)

    # f32 path: must match the reference tightly.
    out_f32 = transition_forward(x, conv_w, bn_gamma, bn_beta, bn_mean, bn_var,
                                 use_dropout=False, compute_dtype="float32")
    out_f32 = jax.block_until_ready(out_f32)
    assert out_f32.shape == (N, Cout, H // 2, W // 2), out_f32.shape
    assert jnp.allclose(out_f32, ref, atol=1e-5, rtol=1e-5), \
        float(jnp.max(jnp.abs(out_f32 - ref)))

    # Default path (bf16 MXU inputs, f32 accumulation/epilogue): loose tolerance.
    out_bf16 = transition_forward(x, conv_w, bn_gamma, bn_beta, bn_mean, bn_var,
                                  use_dropout=False)
    out_bf16 = jax.block_until_ready(out_bf16)
    assert out_bf16.shape == (N, Cout, H // 2, W // 2), out_bf16.shape
    assert float(jnp.max(jnp.abs(out_bf16 - ref))) < 5e-2

    print("KERNEL_OK")
</pallas_src>

<mosaic_0001>
module attributes {stable_mosaic.version = 11 : i64} {
  func.func @_transition_kernel(%arg0: i32, %arg1: i32, %arg2: memref<1x256x4xf32, #tpu.memory_space<vmem>>, %arg3: memref<4x8xf32, #tpu.memory_space<vmem>>, %arg4: memref<1x8xf32, #tpu.memory_space<vmem>>, %arg5: memref<1x8x8x8xf32, #tpu.memory_space<vmem>>) attributes {dimension_semantics = [#tpu.dimension_semantics<parallel>, #tpu.dimension_semantics<parallel>], iteration_bounds = array<i64: 2, 1>, scalar_prefetch = 0 : i64, scratch_operands = 0 : i64, tpu.core_type = #tpu.core_type<tc>, window_params = [{transform_indices = @transform_0, window_bounds = array<i64: 1, 256, 4>}, {pipeline_mode = #tpu.pipeline_mode<synchronous>, transform_indices = @transform_1, window_bounds = array<i64: 4, 8>}, {pipeline_mode = #tpu.pipeline_mode<synchronous>, transform_indices = @transform_2, window_bounds = array<i64: 1, 8>}, {transform_indices = @transform_3, window_bounds = array<i64: 1, 8, 8, 8>}]} {
    %c0 = arith.constant 0 : index
    %c0_0 = arith.constant 0 : index
    %c0_1 = arith.constant 0 : index
    %0 = vector.load %arg2[%c0, %c0_0, %c0_1] : memref<1x256x4xf32, #tpu.memory_space<vmem>>, vector<1x256x4xf32>
    %1 = vector.shape_cast %0 : vector<1x256x4xf32> to vector<256x4xf32>
    %c0_2 = arith.constant 0 : index
    %c0_3 = arith.constant 0 : index
    %2 = vector.load %arg3[%c0_2, %c0_3] : memref<4x8xf32, #tpu.memory_space<vmem>>, vector<4x8xf32>
    %cst = arith.constant dense<0.000000e+00> : vector<256x8xf32>
    %3 = tpu.matmul %1, %2, %cst {dimension_numbers = #tpu.dot_dimension_numbers<[1], [0], [0], [1], [0, 0, 1, 1], [], []>} : vector<256x4xf32>, vector<4x8xf32>, vector<256x8xf32> -> vector<256x8xf32>
    %c0_4 = arith.constant 0 : index
    %c0_5 = arith.constant 0 : index
    %4 = vector.load %arg4[%c0_4, %c0_5] : memref<1x8xf32, #tpu.memory_space<vmem>>, vector<1x8xf32>
    %5 = vector.broadcast %4 : vector<1x8xf32> to vector<256x8xf32>
    %6 = arith.addf %3, %5 : vector<256x8xf32>
    %cst_6 = arith.constant 0.000000e+00 : f32
    %7 = vector.broadcast %cst_6 : f32 to vector<256x8xf32>
    %8 = arith.maximumf %6, %7 : vector<256x8xf32>
    %9 = vector.shape_cast %8 : vector<256x8xf32> to vector<8x2x16x8xf32>
    %10 = vector.extract_strided_slice %9 {offsets = [0, 0, 0, 0], sizes = [8, 1, 16, 8], strides = [1, 1, 1, 1]} : vector<8x2x16x8xf32> to vector<8x1x16x8xf32>
    %11 = vector.shape_cast %10 : vector<8x1x16x8xf32> to vector<8x16x8xf32>
    %12 = vector.extract_strided_slice %9 {offsets = [0, 1, 0, 0], sizes = [8, 1, 16, 8], strides = [1, 1, 1, 1]} : vector<8x2x16x8xf32> to vector<8x1x16x8xf32>
    %13 = vector.shape_cast %12 : vector<8x1x16x8xf32> to vector<8x16x8xf32>
    %14 = arith.addf %11, %13 : vector<8x16x8xf32>
    %15 = vector.shape_cast %14 : vector<8x16x8xf32> to vector<8x8x2x8xf32>
    %cst_7 = arith.constant dense<0.000000e+00> : vector<8x8x8xf32>
    %16 = vector.multi_reduction <add>, %15, %cst_7 [2] : vector<8x8x2x8xf32> to vector<8x8x8xf32>
    %17 = vector.shape_cast %16 : vector<8x8x8xf32> to vector<1x8x8x8xf32>
    %c0_8 = arith.constant 0 : index
    %c0_9 = arith.constant 0 : index
    %c0_10 = arith.constant 0 : index
    %c0_11 = arith.constant 0 : index
    %18 = vector.load %arg5[%c0_8, %c0_9, %c0_10, %c0_11] : memref<1x8x8x8xf32, #tpu.memory_space<vmem>>, vector<1x8x8x8xf32>
    tpu.vector_store %arg5[%c0_8, %c0_9, %c0_10, %c0_11], %17 {strides = array<i32>} : memref<1x8x8x8xf32, #tpu.memory_space<vmem>>, vector<1x8x8x8xf32>,
    return
  }
  func.func @transform_0(%arg0: i32, %arg1: i32) -> (i32, i32, i32) {
    %c0_i32 = arith.constant 0 : i32
    %c0_i32_0 = arith.constant 0 : i32
    return %arg0, %arg1, %c0_i32 : i32, i32, i32
  }
  func.func @transform_1(%arg0: i32, %arg1: i32) -> (i32, i32) {
    %c0_i32 = arith.constant 0 : i32
    %c0_i32_0 = arith.constant 0 : i32
    %c0_i32_1 = arith.constant 0 : i32
    return %c0_i32, %c0_i32_0 : i32, i32
  }
  func.func @transform_2(%arg0: i32, %arg1: i32) -> (i32, i32) {
    %c0_i32 = arith.constant 0 : i32
    %c0_i32_0 = arith.constant 0 : i32
    %c0_i32_1 = arith.constant 0 : i32
    return %c0_i32, %c0_i32_0 : i32, i32
  }
  func.func @transform_3(%arg0: i32, %arg1: i32) -> (i32, i32, i32, i32) {
    %c0_i32 = arith.constant 0 : i32
    %c0_i32_0 = arith.constant 0 : i32
    %c0_i32_1 = arith.constant 0 : i32
    return %arg0, %arg1, %c0_i32, %c0_i32_0 : i32, i32, i32, i32
  }
}

</mosaic_0001>

<bundles_post_ra>
// kernel: transition_forward.1
= control target key start
LH: loop header
LB: loop body
LE: loop exit
PB: predicated region body
PF: predicated region fallthrough
CT: control target
= control target key end

     0   :  { %s1859_s12 = smov 0   ;;  %s1861_s13 = smov 0   ;;  %s2418_s0 = inlined_call_operand.vmem [shape: f32[2,256,4], index: 0, kind: input, shape index: {}]   ;;  %s2419_s1 = inlined_call_operand.vmem [shape: f32[4,8], index: 1, kind: input, shape index: {}]   ;;  %s2420_s2 = inlined_call_operand.vmem [shape: f32[1,8], index: 2, kind: input, shape index: {}]   ;;  %s2421_s3 = inlined_call_operand.vmem [shape: f32[2,8,8,8], index: 3, kind: output, shape index: {}]  }
   0x1   :  { %s1863_s14 = smov 0  }
   0x2 LB: > { %s25_s15 = sadd.s32 1, %s1832_s13  ;;  %p1660_p0 = scmp.ge.s32.totalorder %s1836_s14, 1  ;;  %s1836_s14 = sphi %s1863_s14, %s13_s14   ;;  %s1832_s13 = sphi %s1861_s13, %s2425_s13   ;;  %s1828_s12 = sphi %s1859_s12, %s2424_s12  }
   0x3   : > { %p27_p1 = scmp.ge.s32.totalorder %s25_s15, 2  ;;  %p158_p2 = scmp.lt.s32.totalorder %s1836_s14, 3 }
   0x5   : > { %s2427_s15 = smov (%p27_p1, %s25_s15), 0  ;;  %p159_p3 = pnand %p1660_p0, %p158_p2 }
   0x6   : > { %v242_v0 = vld [vmem:[%s2419_s1] sm:$0xf] (!%p159_p3)  ;;  %vm347_vm0 = vcmask (!%p159_p3), 1043456   ;;  %p191_p4 = scmp.lt.s32.totalorder (!%p159_p3), %s1828_s12, 1  ;;  %vm250_vm1 = vcmask (!%p159_p3), 31744   ;;  %v644_v35 = vlaneseq (!%p159_p3)  ;;  %vm976_vm2 = vcmask (!%p159_p3), 58368  }
   0x7   : > { %162 = sbr.rel (%p159_p3) target bundleno = 407 (0x197), region = 32  ;;  %1736 = vmatprep.subr.msk.mxu0 (!%p159_p3), %vm347_vm0, %v242_v0  ;;  %1786 = vmatprep.subr.msk.mxu1 (!%p159_p3), %vm347_vm0, %v242_v0  ;;  %v1838_v33 = vmov (!%p159_p3), 1983009808   ;;  %v1955_v37 = vld [vmem:[%s2420_s2] ss:$0 sm:$0xff] (!%p159_p3)  ;;  %vm1489_vm3 = vcmask (!%p159_p3), 1041409  }
   0x8   : > { %1737 = vmatpush3.msk.msra.mxu0 (!%p159_p3), %vm347_vm0, %v242_v0  ;;  %1787 = vmatpush3.msk.msra.mxu1 (!%p159_p3), %vm347_vm0, %v242_v0  ;;  %v642_v34 = vunpack.c.l.s4 (!%p159_p3), %v1838_v33  ;;  %v645_v42 = vshrl.u32 (!%p159_p3), %v644_v35, 7  ;;  %vm1491_vm4 = vcmask (!%p159_p3), 1042434   ;;  %vm1493_vm5 = vcmask (!%p159_p3), 1043459  }
   0x9   : > { %vm1495_vm6 = vcmask (!%p159_p3), 1044484   ;;  %vm1497_vm7 = vcmask (!%p159_p3), 1045509   ;;  %vm1499_vm8 = vcmask (!%p159_p3), 1046534   ;;  %vm1501_vm9 = vcmask (!%p159_p3), 1047559  }
   0xa   : > { %v643_v41 = vunpack.c.0.s8 (!%p159_p3), %v642_v34  ;;  %vm1560_vm10 = vcmask (!%p159_p3), 64512  }
   0xc   : > { %v1963_v53 = vsub.s32 (!%p159_p3), %v643_v41, %v645_v42 }
   0xe   : > { %s2429_s12 = smov (!%p191_p4, %s1828_s12), 1 }
   0xf   : > { %s1701_s18 = sshll.u32 %s2429_s12, 8  ;;  %s1702_s24 = sshll.u32 %s2429_s12, 6 }
  0x10   : > { %s1886_s21 = scalar_lea.vmem %s2418_s0, %s1701_s18  ;;  %s2101_s27 = scalar_lea.vmem %s2421_s3, %s1702_s24 }
  0x11   : > { %v210_v1 = vld [vmem:[%s1886_s21] sm:$0xff]  ;;  %v211_v3 = vld [vmem:[%s1886_s21 + $0x8] sm:$0xff]  ;;  %v212_v5 = vld [vmem:[%s1886_s21 + $0x10] sm:$0xff] }
  0x12   : > { %v226_v2 = vld [vmem:[%s1886_s21 + $0x80] sm:$0xff]  ;;  %1738 = vmatprep.mubr.msk.f32.mxu0 %vm250_vm1, %v210_v1  ;;  %v227_v4 = vld [vmem:[%s1886_s21 + $0x88] sm:$0xff]  ;;  %v228_v6 = vld [vmem:[%s1886_s21 + $0x90] sm:$0xff] }
  0x13   : > { %1762 = vmatprep.mubr.msk.f32.mxu1 %vm250_vm1, %v226_v2  ;;  %1739 = vmatmul.mubr.msk.f32.vlgmr.msra.gmra.mrb[0].mxu0 %vm250_vm1, %v211_v3  ;;  %v213_v7 = vld [vmem:[%s1886_s21 + $0x18] sm:$0xff]  ;;  %v214_v9 = vld [vmem:[%s1886_s21 + $0x20] sm:$0xff]  ;;  %v215_v11 = vld [vmem:[%s1886_s21 + $0x28] sm:$0xff] }
  0x14   : > { %1763 = vmatmul.mubr.msk.f32.vlgmr.msra.gmra.mrb[0].mxu1 %vm250_vm1, %v227_v4  ;;  %1741 = vmatprep.mubr.msk.f32.mxu0 %vm250_vm1, %v212_v5  ;;  %v229_v8 = vld [vmem:[%s1886_s21 + $0x98] sm:$0xff]  ;;  %v230_v10 = vld [vmem:[%s1886_s21 + $0xa0] sm:$0xff]  ;;  %v231_v12 = vld [vmem:[%s1886_s21 + $0xa8] sm:$0xff] }
  0x15   : > { %1765 = vmatprep.mubr.msk.f32.mxu1 %vm250_vm1, %v228_v6  ;;  %v216_v13 = vld [vmem:[%s1886_s21 + $0x30] sm:$0xff]  ;;  %v217_v15 = vld [vmem:[%s1886_s21 + $0x38] sm:$0xff]  ;;  %v218_v17 = vld [vmem:[%s1886_s21 + $0x40] sm:$0xff] }
  0x16   : > { %v232_v14 = vld [vmem:[%s1886_s21 + $0xb0] sm:$0xff]  ;;  %v233_v16 = vld [vmem:[%s1886_s21 + $0xb8] sm:$0xff]  ;;  %v234_v18 = vld [vmem:[%s1886_s21 + $0xc0] sm:$0xff] }
  0x17   : > { %1742 = vmatmul.mubr.msk.f32.gmra.mrb[2].mxu0 %vm250_vm1, %v213_v7  ;;  %v219_v19 = vld [vmem:[%s1886_s21 + $0x48] sm:$0xff]  ;;  %v220_v21 = vld [vmem:[%s1886_s21 + $0x50] sm:$0xff]  ;;  %v221_v23 = vld [vmem:[%s1886_s21 + $0x58] sm:$0xff] }
  0x18   : > { %1766 = vmatmul.mubr.msk.f32.gmra.mrb[2].mxu1 %vm250_vm1, %v229_v8  ;;  %1744 = vmatprep.mubr.msk.f32.mxu0 %vm250_vm1, %v214_v9  ;;  %v235_v20 = vld [vmem:[%s1886_s21 + $0xc8] sm:$0xff]  ;;  %v236_v22 = vld [vmem:[%s1886_s21 + $0xd0] sm:$0xff]  ;;  %v237_v24 = vld [vmem:[%s1886_s21 + $0xd8] sm:$0xff] }
  0x19   : > { %1768 = vmatprep.mubr.msk.f32.mxu1 %vm250_vm1, %v230_v10  ;;  %v222_v25 = vld [vmem:[%s1886_s21 + $0x60] sm:$0xff]  ;;  %v223_v27 = vld [vmem:[%s1886_s21 + $0x68] sm:$0xff]  ;;  %v224_v29 = vld [vmem:[%s1886_s21 + $0x70] sm:$0xff] }
  0x1a   : > { %v238_v26 = vld [vmem:[%s1886_s21 + $0xe0] sm:$0xff]  ;;  %v239_v28 = vld [vmem:[%s1886_s21 + $0xe8] sm:$0xff]  ;;  %v240_v30 = vld [vmem:[%s1886_s21 + $0xf0] sm:$0xff] }
  0x1b   : > { %1745 = vmatmul.mubr.msk.f32.gmra.mrb[4].mxu0 %vm250_vm1, %v215_v11  ;;  %v225_v31 = vld [vmem:[%s1886_s21 + $0x78] sm:$0xff] }
  0x1c   : > { %1769 = vmatmul.mubr.msk.f32.gmra.mrb[4].mxu1 %vm250_vm1, %v231_v12  ;;  %1747 = vmatprep.mubr.msk.f32.mxu0 %vm250_vm1, %v216_v13  ;;  %v241_v32 = vld [vmem:[%s1886_s21 + $0xf8] sm:$0xff] }
  0x1d   : > { %1771 = vmatprep.mubr.msk.f32.mxu1 %vm250_vm1, %v232_v14 }
  0x1f   : > { %1748 = vmatmul.mubr.msk.f32.gmra.mrb[6].mxu0 %vm250_vm1, %v217_v15 }
  0x20   : > { %1772 = vmatmul.mubr.msk.f32.gmra.mrb[6].mxu1 %vm250_vm1, %v233_v16  ;;  %1750 = vmatprep.mubr.msk.f32.mxu0 %vm250_vm1, %v218_v17 }
  0x21   : > { %1774 = vmatprep.mubr.msk.f32.mxu1 %vm250_vm1, %v234_v18 }
  0x23   : > { %1751 = vmatmul.mubr.msk.f32.gmra.mrb[8].mxu0 %vm250_vm1, %v219_v19 }
  0x24   : > { %1775 = vmatmul.mubr.msk.f32.gmra.mrb[8].mxu1 %vm250_vm1, %v235_v20  ;;  %1753 = vmatprep.mubr.msk.f32.mxu0 %vm250_vm1, %v220_v21 }
  0x25   : > { %1777 = vmatprep.mubr.msk.f32.mxu1 %vm250_vm1, %v236_v22 }
  0x27   : > { %1754 = vmatmul.mubr.msk.f32.gmra.mrb[10].mxu0 %vm250_vm1, %v221_v23 }
  0x28   : > { %1778 = vmatmul.mubr.msk.f32.gmra.mrb[10].mxu1 %vm250_vm1, %v237_v24  ;;  %1756 = vmatprep.mubr.msk.f32.mxu0 %vm250_vm1, %v222_v25 }
  0x29   : > { %1780 = vmatprep.mubr.msk.f32.mxu1 %vm250_vm1, %v238_v26 }
  0x2b   : > { %1757 = vmatmul.mubr.msk.f32.gmra.mrb[12].mxu0 %vm250_vm1, %v223_v27 }
  0x2c   : > { %1781 = vmatmul.mubr.msk.f32.gmra.mrb[12].mxu1 %vm250_vm1, %v239_v28  ;;  %1759 = vmatprep.mubr.msk.f32.mxu0 %vm250_vm1, %v224_v29 }
  0x2d   : > { %1783 = vmatprep.mubr.msk.f32.mxu1 %vm250_vm1, %v240_v30 }
  0x2f   : > { %1760 = vmatmul.mubr.msk.f32.gmra.mrb[14].mxu0 %vm250_vm1, %v225_v31 }
  0x30   : > { %1784 = vmatmul.mubr.msk.f32.gmra.mrb[14].mxu1 %vm250_vm1, %v241_v32 }
  0xe6   : > { %v1740_v36 = vpop.f32.mrb[0].mxu0 }
  0xe7   : > { %v1764_v38 = vpop.f32.mrb[0].mxu1  ;;  %v417_v39 = vpop.f32.mrb[1].mxu0  ;;  %v423_v43 = vadd.f32 %v1740_v36, %v1955_v37 }
  0xe8   : > { %v497_v40 = vpop.f32.mrb[1].mxu1  ;;  %v503_v44 = vadd.f32 %v1764_v38, %v1955_v37  ;;  %v418_v45 = vadd.f32 %v1955_v37, %v417_v39 }
  0xe9   : > { %v498_v46 = vadd.f32 %v1955_v37, %v497_v40  ;;  %v577_v56 = vmax.f32 %v423_v43, 0.0 }
  0xea   : > { %v1743_v47 = vpop.f32.mrb[2].mxu0  ;;  %v593_v57 = vmax.f32 %v503_v44, 0.0  ;;  %v576_v60 = vmax.f32 %v418_v45, 0.0 }
  0xeb   : > { %v1767_v48 = vpop.f32.mrb[2].mxu1  ;;  %v433_v49 = vadd.f32 %v1743_v47, %v1955_v37  ;;  %v427_v51 = vpop.f32.mrb[3].mxu0  ;;  %v592_v61 = vmax.f32 %v498_v46, 0.0 }
  0xec   : > { %v513_v50 = vadd.f32 %v1767_v48, %v1955_v37  ;;  %v507_v52 = vpop.f32.mrb[3].mxu1  ;;  %v428_v54 = vadd.f32 %v1955_v37, %v427_v51 }
  0xed   : > { %v508_v55 = vadd.f32 %v1955_v37, %v507_v52  ;;  %v579_v58 = vmax.f32 %v433_v49, 0.0 }
  0xee   : > { %v595_v59 = vmax.f32 %v513_v50, 0.0  ;;  %v578_v62 = vmax.f32 %v428_v54, 0.0  ;;  %v1746_v0 = vpop.f32.mrb[4].mxu0 }
  0xef   : > { %v594_v63 = vmax.f32 %v508_v55, 0.0  ;;  %v1770_v1 = vpop.f32.mrb[4].mxu1  ;;  %v609_v2 = vadd.f32 %v579_v58, %v577_v56  ;;  %v437_v4 = vpop.f32.mrb[5].mxu0  ;;  %v1972_v8 = vadd.f32 %v1746_v0, %v1955_v37 }
  0xf0   : > { %v617_v3 = vadd.f32 %v595_v59, %v593_v57  ;;  %v517_v5 = vpop.f32.mrb[5].mxu1  ;;  %v1967_v6 = vadd.f32 %v578_v62, %v576_v60  ;;  %v1979_v14 = vadd.f32 %v1770_v1, %v1955_v37  ;;  %v1982_v15 = vadd.f32 %v1955_v37, %v437_v4 }
  0xf1   : > { %v1969_v7 = vadd.f32 %v594_v63, %v592_v61  ;;  %v657_v9 = vcombine.high %v609_v2, %v609_v2  ;;  %v664_v10 = vrot.slane %v609_v2, %v1963_v53  ;;  %v1985_v16 = vadd.f32 %v1955_v37, %v517_v5 }
  0xf2   : > { %v793_v11 = vcombine.high %v617_v3, %v617_v3  ;;  %v800_v12 = vrot.slane %v617_v3, %v1963_v53  ;;  %v640_v13 = vcombine.high %v1967_v6, %v1967_v6  ;;  %v1987_v17 = vpop.f32.mrb[6].mxu0  ;;  %v2001_v28 = vrot.slane %v1967_v6, %v1963_v53 }
  0xf3   : > { %v1989_v18 = vpop.f32.mrb[6].mxu1  ;;  %v671_v19 = vrot.slane %v657_v9, %v1963_v53  ;;  %v672_v20 = vcombine.high %v664_v10, %v664_v10  ;;  %v1005_v21 = vsel %vm976_vm2, %v664_v10, 0.0  ;;  %v1994_v23 = vpop.f32.mrb[7].mxu0 }
  0xf4   : > { %v807_v22 = vrot.slane %v793_v11, %v1963_v53  ;;  %v1996_v24 = vpop.f32.mrb[7].mxu1  ;;  %v1006_v25 = vrot.slane %v1005_v21, 4  ;;  %v808_v26 = vcombine.high %v800_v12, %v800_v12  ;;  %v1229_v27 = vsel %vm976_vm2, %v800_v12, 0.0 }
  0xf5   : > { %v673_v29 = vcombine.high %v671_v19, %v671_v19  ;;  %v1012_v30 = vsel %vm976_vm2, %v672_v20, 0.0  ;;  %v1019_v31 = vsel %vm976_vm2, %v671_v19, 0.0  ;;  %v1230_v36 = vrot.slane %v1229_v27, 4 }
  0xf6   : > { %v809_v32 = vcombine.high %v807_v22, %v807_v22  ;;  %v1007_v33 = vadd.f32 %v1006_v25, %v1005_v21  ;;  %v1013_v34 = vrot.slane %v1012_v30, 4  ;;  %v1020_v35 = vrot.slane %v1019_v31, 4  ;;  %v2005_v38 = vpop.f32.mrb[8].mxu0 }
  0xf7   : > { %v2007_v39 = vpop.f32.mrb[8].mxu1  ;;  %v1026_v40 = vsel %vm976_vm2, %v673_v29, 0.0  ;;  %v1236_v41 = vsel %vm976_vm2, %v808_v26, 0.0  ;;  %v1243_v42 = vsel %vm976_vm2, %v807_v22, 0.0  ;;  %v2013_v44 = vpop.f32.mrb[9].mxu0  ;;  %v1231_v50 = vadd.f32 %v1230_v36, %v1229_v27 }
  0xf8   : > { %v1250_v43 = vsel %vm976_vm2, %v809_v32, 0.0  ;;  %v2015_v45 = vpop.f32.mrb[9].mxu1  ;;  %v1008_v46 = vrot.slane %v1007_v33, 2  ;;  %v1014_v47 = vadd.f32 %v1013_v34, %v1012_v30  ;;  %v1021_v48 = vadd.f32 %v1020_v35, %v1019_v31 }
  0xf9   : > { %v1027_v49 = vrot.slane %v1026_v40, 4  ;;  %v1237_v51 = vrot.slane %v1236_v41, 4  ;;  %v1244_v52 = vrot.slane %v1243_v42, 4  ;;  %v1251_v54 = vrot.slane %v1250_v43, 4 }
  0xfa   : > { %v1009_v55 = vadd.f32 %v1008_v46, %v1007_v33  ;;  %v1015_v56 = vrot.slane %v1014_v47, 2  ;;  %v1022_v57 = vrot.slane %v1021_v48, 2  ;;  %v2017_v59 = vpop.f32.mrb[10].mxu0  ;;  %v1232_v61 = vrot.slane %v1231_v50, 2 }
  0xfb   : > { %v1028_v58 = vadd.f32 %v1027_v49, %v1026_v40  ;;  %v2019_v60 = vpop.f32.mrb[10].mxu1  ;;  %v1238_v62 = vadd.f32 %v1237_v51, %v1236_v41  ;;  %v1245_v63 = vadd.f32 %v1244_v52, %v1243_v42  ;;  %v1252_v0 = vadd.f32 %v1251_v54, %v1250_v43  ;;  %v2021_v1 = vpop.f32.mrb[11].mxu0 }
  0xfc   : > { %v2023_v2 = vpop.f32.mrb[11].mxu1  ;;  %v1010_v3 = vrot.slane %v1009_v55, 1  ;;  %v1016_v4 = vadd.f32 %v1015_v56, %v1014_v47  ;;  %v1023_v5 = vadd.f32 %v1022_v57, %v1021_v48  ;;  %v1233_v10 = vadd.f32 %v1232_v61, %v1231_v50 }
  0xfd   : > { %v1029_v9 = vrot.slane %v1028_v58, 2  ;;  %v1239_v11 = vrot.slane %v1238_v62, 2  ;;  %v1246_v12 = vrot.slane %v1245_v63, 2  ;;  %v1253_v19 = vrot.slane %v1252_v0, 2 }
  0xfe   : > { %v1017_v20 = vrot.slane %v1016_v4, 1  ;;  %v1024_v21 = vrot.slane %v1023_v5, 1  ;;  %v654_v25 = vrot.slane %v640_v13, %v1963_v53  ;;  %v2029_v26 = vpop.f32.mrb[12].mxu0  ;;  %v1234_v29 = vrot.slane %v1233_v10, 1 }
  0xff   : > { %v1030_v22 = vadd.f32 %v1029_v9, %v1028_v58  ;;  %v2031_v27 = vpop.f32.mrb[12].mxu1  ;;  %v2033_v30 = vadd.f32 %v1239_v11, %v1238_v62  ;;  %v2035_v31 = vadd.f32 %v1246_v12, %v1245_v63  ;;  %v2037_v32 = vadd.f32 %v1253_v19, %v1252_v0  ;;  %v2039_v33 = vpop.f32.mrb[13].mxu0 }
 0x100   : > { %v2041_v34 = vpop.f32.mrb[13].mxu1  ;;  %v655_v6 = vcombine.high %v2001_v28, %v2001_v28  ;;  %v776_v13 = vcombine.high %v1969_v7, %v1969_v7  ;;  %v783_v36 = vrot.slane %v1969_v7, %v1963_v53  ;;  %v2049_v40 = vadd.f32 %v1010_v3, %v1009_v55 }
 0x101   : > { %v1031_v35 = vrot.slane %v1030_v22, 1  ;;  %v2051_v41 = vadd.f32 %v1017_v20, %v1016_v4  ;;  %v2053_v42 = vadd.f32 %v1024_v21, %v1023_v5  ;;  %v2055_v43 = vadd.f32 %v1234_v29, %v1233_v10 }
 0x102   : > { %v1241_v46 = vrot.slane %v2033_v30, 1  ;;  %v656_v47 = vcombine.high %v654_v25, %v654_v25  ;;  %v977_v48 = vsel %vm976_vm2, %v2001_v28, 0.0  ;;  %v984_v49 = vsel %vm976_vm2, %v655_v6, 0.0  ;;  %v2061_v50 = vpop.f32.mrb[14].mxu0 }
 0x103   : > { %v2063_v51 = vpop.f32.mrb[14].mxu1  ;;  %v2065_v7 = vadd.f32 %v1031_v35, %v1030_v22  ;;  %v978_v55 = vrot.slane %v977_v48, 4  ;;  %v2069_v56 = vpop.f32.mrb[15].mxu0  ;;  %v985_v58 = vrot.slane %v984_v49, 4  ;;  %v991_v28 = vsel %vm976_vm2, %v654_v25, 0.0 }
 0x104   : > { %v2071_v57 = vpop.f32.mrb[15].mxu1  ;;  %v998_v61 = vsel %vm976_vm2, %v656_v47, 0.0  ;;  %v790_v62 = vrot.slane %v776_v13, %v1963_v53  ;;  %v992_v0 = vrot.slane %v991_v28, 4  ;;  %v791_v4 = vcombine.high %v783_v36, %v783_v36 }
 0x105   : > { %v979_v63 = vadd.f32 %v978_v55, %v977_v48  ;;  %v999_v3 = vrot.slane %v998_v61, 4  ;;  %v986_v5 = vadd.f32 %v985_v58, %v984_v49  ;;  %v1201_v10 = vsel %vm976_vm2, %v783_v36, 0.0 }
 0x106   : > { %v792_v9 = vcombine.high %v790_v62, %v790_v62  ;;  %v1215_v11 = vsel %vm976_vm2, %v790_v62, 0.0  ;;  %v993_v19 = vadd.f32 %v992_v0, %v991_v28  ;;  %v1202_v21 = vrot.slane %v1201_v10, 4 }
 0x107   : > { %v980_v12 = vrot.slane %v979_v63, 2  ;;  %v1000_v20 = vadd.f32 %v999_v3, %v998_v61  ;;  %v987_v22 = vrot.slane %v986_v5, 2  ;;  %v1208_v25 = vsel %vm976_vm2, %v791_v4, 0.0 }
 0x108   : > { %v1216_v29 = vrot.slane %v1215_v11, 4  ;;  %v1222_v35 = vsel %vm976_vm2, %v792_v9, 0.0  ;;  %v994_v13 = vrot.slane %v993_v19, 2  ;;  %v1203_v48 = vadd.f32 %v1202_v21, %v1201_v10 }
 0x109   : > { %v981_v6 = vadd.f32 %v980_v12, %v979_v63  ;;  %v1001_v47 = vrot.slane %v1000_v20, 2  ;;  %v988_v36 = vadd.f32 %v987_v22, %v986_v5  ;;  %v1209_v49 = vrot.slane %v1208_v25, 4 }
 0x10a   : > { %v1217_v55 = vadd.f32 %v1216_v29, %v1215_v11  ;;  %v1223_v58 = vrot.slane %v1222_v35, 4  ;;  %v995_v61 = vadd.f32 %v994_v13, %v993_v19  ;;  %v1204_v0 = vrot.slane %v1203_v48, 2 }
 0x10b   : > { %v982_v28 = vrot.slane %v981_v6, 1  ;;  %v1002_v62 = vadd.f32 %v1001_v47, %v1000_v20  ;;  %v989_v3 = vrot.slane %v988_v36, 1  ;;  %v1210_v4 = vadd.f32 %v1209_v49, %v1208_v25 }
 0x10c   : > { %v1218_v54 = vrot.slane %v1217_v55, 2  ;;  %v1224_v9 = vadd.f32 %v1223_v58, %v1222_v35  ;;  %v996_v12 = vrot.slane %v995_v61, 1  ;;  %v1205_v10 = vadd.f32 %v1204_v0, %v1203_v48 }
 0x10d   : > { %v983_v63 = vadd.f32 %v982_v28, %v981_v6  ;;  %v1003_v52 = vrot.slane %v1002_v62, 1  ;;  %v990_v5 = vadd.f32 %v989_v3, %v988_v36  ;;  %v1211_v21 = vrot.slane %v1210_v4, 2 }
 0x10e   : > { %v1219_v22 = vadd.f32 %v1218_v54, %v1217_v55  ;;  %v1225_v11 = vrot.slane %v1224_v9, 2  ;;  %v1242_v19 = vadd.f32 %v1241_v46, %v2033_v30  ;;  %v997_v20 = vadd.f32 %v996_v12, %v995_v61 }
 0x10f   : > { %v1004_v29 = vadd.f32 %v1003_v52, %v1002_v62  ;;  %v1206_v13 = vrot.slane %v1205_v10, 1  ;;  %v1490_v25 = vsel %vm1489_vm3, %v990_v5, %v983_v63  ;;  %v1212_v47 = vadd.f32 %v1211_v21, %v1210_v4 }
 0x110   : > { %v1220_v35 = vrot.slane %v1219_v22, 1  ;;  %v1226_v6 = vadd.f32 %v1225_v11, %v1224_v9  ;;  %v2422_v49 = vrot.slane %v2035_v31, 1  ;;  %v1492_v54 = vsel %vm1491_vm4, %v997_v20, %v1490_v25 }
 0x111   : > { %v1207_v36 = vadd.f32 %v1206_v13, %v1205_v10  ;;  %v581_v55 = vmax.f32 %v1972_v8, 0.0  ;;  %v1494_v30 = vsel %vm1493_vm5, %v1004_v29, %v1492_v54  ;;  %v1213_v46 = vrot.slane %v1212_v47, 1 }
 0x112   : > { %v1249_v48 = vadd.f32 %v2422_v49, %v2035_v31  ;;  %v1227_v52 = vrot.slane %v1226_v6, 1  ;;  %v597_v58 = vmax.f32 %v1979_v14, 0.0  ;;  %v1496_v28 = vsel %vm1495_vm6, %v2049_v40, %v1494_v30 }
 0x113   : > { %v1221_v61 = vadd.f32 %v1220_v35, %v1219_v22  ;;  %v453_v62 = vadd.f32 %v1987_v17, %v1955_v37  ;;  %v533_v31 = vadd.f32 %v1989_v18, %v1955_v37  ;;  %v1498_v8 = vsel %vm1497_vm7, %v2051_v41, %v1496_v28 }
 0x114   : > { %v1214_v14 = vadd.f32 %v1213_v46, %v1212_v47  ;;  %v1228_v0 = vadd.f32 %v1227_v52, %v1226_v6  ;;  %v448_v40 = vadd.f32 %v1955_v37, %v1994_v23  ;;  %v1500_v17 = vsel %vm1499_vm8, %v2053_v42, %v1498_v8 }
 0x115   : > { %v580_v3 = vmax.f32 %v1982_v15, 0.0  ;;  %v583_v18 = vmax.f32 %v453_v62, 0.0  ;;  %v599_v4 = vmax.f32 %v533_v31, 0.0  ;;  %v1502_v9 = vsel %vm1501_vm9, %v2065_v7, %v1500_v17 }
 0x116   : > { %v1524_v63 = vsel %vm1489_vm3, %v1214_v14, %v1207_v36  ;;  %v582_v12 = vmax.f32 %v448_v40, 0.0  ;;  %v2115_v41 = vadd.f32 %v1955_v37, %v1996_v24  ;;  %v2423_v23 = vrot.slane %v2037_v32, 1  ;;  %1561 = vst.msk [vmem:[%s2101_s27] sm:$0xff] %vm1560_vm10, %v1502_v9 }
 0x117   : > { %v1525_v15 = vsel %vm1491_vm4, %v1221_v61, %v1524_v63  ;;  %v611_v42 = vadd.f32 %v583_v18, %v581_v55  ;;  %v619_v5 = vadd.f32 %v599_v4, %v597_v58  ;;  %v596_v7 = vmax.f32 %v1985_v16, 0.0 }
 0x118   : > { %v1256_v10 = vadd.f32 %v2423_v23, %v2037_v32  ;;  %v1526_v21 = vsel %vm1493_vm5, %v1228_v0, %v1525_v15  ;;  %v2125_v22 = vadd.f32 %v582_v12, %v580_v3  ;;  %v2129_v24 = vadd.f32 %v2005_v38, %v1955_v37 }
 0x119   : > { %v1527_v11 = vsel %vm1495_vm6, %v2055_v43, %v1526_v21  ;;  %v691_v32 = vcombine.high %v611_v42, %v611_v42  ;;  %v698_v20 = vrot.slane %v611_v42, %v1963_v53  ;;  %v827_v29 = vcombine.high %v619_v5, %v619_v5 }
 0x11a   : > { %v1528_v13 = vsel %vm1497_vm7, %v1242_v19, %v1527_v11  ;;  %v834_v25 = vrot.slane %v619_v5, %v1963_v53  ;;  %v674_v47 = vcombine.high %v2125_v22, %v2125_v22  ;;  %v598_v35 = vmax.f32 %v2115_v41, 0.0 }
 0x11b   : > { %v1529_v38 = vsel %vm1499_vm8, %v1249_v48, %v1528_v13  ;;  %v705_v6 = vrot.slane %v691_v32, %v1963_v53  ;;  %v706_v49 = vcombine.high %v698_v20, %v698_v20  ;;  %v1061_v43 = vsel %vm976_vm2, %v698_v20, 0.0 }
 0x11c   : > { %v1530_v54 = vsel %vm1501_vm9, %v1256_v10, %v1529_v38  ;;  %v1062_v36 = vrot.slane %v1061_v43, 4  ;;  %v841_v55 = vrot.slane %v827_v29, %v1963_v53  ;;  %v842_v19 = vcombine.high %v834_v25, %v834_v25 }
 0x11d   : > { %1565 = vst.msk [vmem:[%s2101_s27 + $0x20] sm:$0xff] %vm1560_vm10, %v1530_v54  ;;  %v707_v30 = vcombine.high %v705_v6, %v705_v6  ;;  %v1068_v46 = vsel %vm976_vm2, %v706_v49, 0.0  ;;  %v1075_v52 = vsel %vm976_vm2, %v705_v6, 0.0  ;;  %v1285_v48 = vsel %vm976_vm2, %v834_v25, 0.0 }
 0x11e   : > { %v1063_v58 = vadd.f32 %v1062_v36, %v1061_v43  ;;  %v1069_v28 = vrot.slane %v1068_v46, 4  ;;  %v1076_v61 = vrot.slane %v1075_v52, 4  ;;  %v843_v62 = vcombine.high %v841_v55, %v841_v55 }
 0x11f   : > { %v1082_v31 = vsel %vm976_vm2, %v707_v30, 0.0  ;;  %v1286_v8 = vrot.slane %v1285_v48, 4  ;;  %v1292_v14 = vsel %vm976_vm2, %v842_v19, 0.0  ;;  %v1299_v0 = vsel %vm976_vm2, %v841_v55, 0.0 }
 0x120   : > { %v1064_v40 = vrot.slane %v1063_v58, 2  ;;  %v1070_v17 = vadd.f32 %v1069_v28, %v1068_v46  ;;  %v1077_v3 = vadd.f32 %v1076_v61, %v1075_v52  ;;  %v1083_v18 = vrot.slane %v1082_v31, 4 }
 0x121   : > { %v1287_v4 = vadd.f32 %v1286_v8, %v1285_v48  ;;  %v1293_v9 = vrot.slane %v1292_v14, 4  ;;  %v1300_v63 = vrot.slane %v1299_v0, 4  ;;  %v1306_v12 = vsel %vm976_vm2, %v843_v62, 0.0 }
 0x122   : > { %v1065_v23 = vadd.f32 %v1064_v40, %v1063_v58  ;;  %v1071_v10 = vrot.slane %v1070_v17, 2  ;;  %v1078_v15 = vrot.slane %v1077_v3, 2  ;;  %v1084_v42 = vadd.f32 %v1083_v18, %v1082_v31 }
 0x123   : > { %v1288_v5 = vrot.slane %v1287_v4, 2  ;;  %v1294_v21 = vadd.f32 %v1293_v9, %v1292_v14  ;;  %v1301_v11 = vadd.f32 %v1300_v63, %v1299_v0  ;;  %v1307_v32 = vrot.slane %v1306_v12, 4 }
 0x124   : > { %v1066_v20 = vrot.slane %v1065_v23, 1  ;;  %v1072_v29 = vadd.f32 %v1071_v10, %v1070_v17  ;;  %v1079_v13 = vadd.f32 %v1078_v15, %v1077_v3  ;;  %v1085_v25 = vrot.slane %v1084_v42, 2 }
 0x125   : > { %v1289_v38 = vadd.f32 %v1288_v5, %v1287_v4  ;;  %v1295_v6 = vrot.slane %v1294_v21, 2  ;;  %v1302_v49 = vrot.slane %v1301_v11, 2  ;;  %v1308_v43 = vadd.f32 %v1307_v32, %v1306_v12 }
 0x126   : > { %v1073_v54 = vrot.slane %v1072_v29, 1  ;;  %v1080_v36 = vrot.slane %v1079_v13, 1  ;;  %v1086_v55 = vadd.f32 %v1085_v25, %v1084_v42  ;;  %v681_v19 = vrot.slane %v2125_v22, %v1963_v53 }
 0x127   : > { %v1290_v30 = vrot.slane %v1289_v38, 1  ;;  %v1296_v46 = vadd.f32 %v1295_v6, %v1294_v21  ;;  %v1303_v52 = vadd.f32 %v1302_v49, %v1301_v11  ;;  %v1309_v48 = vrot.slane %v1308_v43, 2 }
 0x128   : > { %v1087_v58 = vrot.slane %v1086_v55, 1  ;;  %v688_v28 = vrot.slane %v674_v47, %v1963_v53  ;;  %v585_v61 = vmax.f32 %v2129_v24, 0.0  ;;  %v2159_v62 = vadd.f32 %v2007_v39, %v1955_v37 }
 0x129   : > { %v2161_v31 = vadd.f32 %v1066_v20, %v1065_v23  ;;  %v2163_v8 = vadd.f32 %v1073_v54, %v1072_v29  ;;  %v2165_v14 = vadd.f32 %v1080_v36, %v1079_v13  ;;  %v1297_v22 = vrot.slane %v1296_v46, 1 }
 0x12a   : > { %v1304_v0 = vrot.slane %v1303_v52, 1  ;;  %v689_v40 = vcombine.high %v681_v19, %v681_v19  ;;  %v690_v17 = vcombine.high %v688_v28, %v688_v28  ;;  %v1033_v3 = vsel %vm976_vm2, %v681_v19, 0.0 }
 0x12b   : > { %v2168_v18 = vadd.f32 %v1087_v58, %v1086_v55  ;;  %v2170_v47 = vadd.f32 %v1290_v30, %v1289_v38  ;;  %v1310_v4 = vadd.f32 %v1309_v48, %v1308_v43  ;;  %v1034_v9 = vrot.slane %v1033_v3, 4 }
 0x12c   : > { %v1040_v39 = vsel %vm976_vm2, %v689_v40, 0.0  ;;  %v1047_v63 = vsel %vm976_vm2, %v688_v28, 0.0  ;;  %v1054_v12 = vsel %vm976_vm2, %v690_v17, 0.0  ;;  %v618_v23 = vadd.f32 %v598_v35, %v596_v7 }
 0x12d   : > { %v2179_v10 = vadd.f32 %v1297_v22, %v1296_v46  ;;  %v1035_v15 = vadd.f32 %v1034_v9, %v1033_v3  ;;  %v1041_v42 = vrot.slane %v1040_v39, 4  ;;  %v1048_v5 = vrot.slane %v1047_v63, 4 }
 0x12e   : > { %v2181_v21 = vadd.f32 %v1304_v0, %v1303_v52  ;;  %v1055_v11 = vrot.slane %v1054_v12, 4  ;;  %v810_v32 = vcombine.high %v618_v23, %v618_v23  ;;  %v817_v20 = vrot.slane %v618_v23, %v1963_v53 }
 0x12f   : > { %v1311_v29 = vrot.slane %v1310_v4, 1  ;;  %v1036_v13 = vrot.slane %v1035_v15, 2  ;;  %v1042_v25 = vadd.f32 %v1041_v42, %v1040_v39  ;;  %v1049_v38 = vadd.f32 %v1048_v5, %v1047_v63 }
 0x130   : > { %v1056_v6 = vadd.f32 %v1055_v11, %v1054_v12  ;;  %v824_v16 = vrot.slane %v810_v32, %v1963_v53  ;;  %v825_v41 = vcombine.high %v817_v20, %v817_v20  ;;  %v1257_v7 = vsel %vm976_vm2, %v817_v20, 0.0 }
 0x131   : > { %v1037_v35 = vadd.f32 %v1036_v13, %v1035_v15  ;;  %v1043_v49 = vrot.slane %v1042_v25, 2  ;;  %v1050_v43 = vrot.slane %v1049_v38, 2  ;;  %v1258_v54 = vrot.slane %v1257_v7, 4 }
 0x132   : > { %v1057_v36 = vrot.slane %v1056_v6, 2  ;;  %v826_v55 = vcombine.high %v824_v16, %v824_v16  ;;  %v1264_v19 = vsel %vm976_vm2, %v825_v41, 0.0  ;;  %v1271_v30 = vsel %vm976_vm2, %v824_v16, 0.0 }
 0x133   : > { %v1038_v46 = vrot.slane %v1037_v35, 1  ;;  %v1044_v52 = vadd.f32 %v1043_v49, %v1042_v25  ;;  %v1051_v48 = vadd.f32 %v1050_v43, %v1049_v38  ;;  %v1259_v58 = vadd.f32 %v1258_v54, %v1257_v7 }
 0x134   : > { %v1058_v28 = vadd.f32 %v1057_v36, %v1056_v6  ;;  %v1265_v22 = vrot.slane %v1264_v19, 4  ;;  %v1272_v0 = vrot.slane %v1271_v30, 4  ;;  %v1278_v40 = vsel %vm976_vm2, %v826_v55, 0.0 }
 0x135   : > { %v2189_v17 = vadd.f32 %v1311_v29, %v1310_v4  ;;  %v1045_v3 = vrot.slane %v1044_v52, 1  ;;  %v1052_v9 = vrot.slane %v1051_v48, 1  ;;  %v1260_v39 = vrot.slane %v1259_v58, 2 }
 0x136   : > { %v1059_v63 = vrot.slane %v1058_v28, 1  ;;  %v1266_v12 = vadd.f32 %v1265_v22, %v1264_v19  ;;  %v1273_v23 = vadd.f32 %v1272_v0, %v1271_v30  ;;  %v1279_v15 = vrot.slane %v1278_v40, 4 }
 0x137   : > { %v1039_v42 = vadd.f32 %v1038_v46, %v1037_v35  ;;  %v1046_v5 = vadd.f32 %v1045_v3, %v1044_v52  ;;  %v1053_v11 = vadd.f32 %v1052_v9, %v1051_v48  ;;  %v1261_v32 = vadd.f32 %v1260_v39, %v1259_v58 }
 0x138   : > { %v1060_v20 = vadd.f32 %v1059_v63, %v1058_v28  ;;  %v1267_v13 = vrot.slane %v1266_v12, 2  ;;  %v1274_v25 = vrot.slane %v1273_v23, 2  ;;  %v1280_v38 = vadd.f32 %v1279_v15, %v1278_v40 }
 0x139   : > { %v1503_v6 = vsel %vm1489_vm3, %v1046_v5, %v1039_v42  ;;  %v1262_v16 = vrot.slane %v1261_v32, 1  ;;  %v601_v4 = vmax.f32 %v2159_v62, 0.0  ;;  %v473_v29 = vadd.f32 %v2017_v59, %v1955_v37 }
 0x13a   : > { %v1504_v41 = vsel %vm1491_vm4, %v1053_v11, %v1503_v6  ;;  %v1268_v7 = vadd.f32 %v1267_v13, %v1266_v12  ;;  %v1275_v49 = vadd.f32 %v1274_v25, %v1273_v23  ;;  %v1281_v35 = vrot.slane %v1280_v38, 2 }
 0x13b   : > { %v1505_v43 = vsel %vm1493_vm5, %v1060_v20, %v1504_v41  ;;  %v1263_v54 = vadd.f32 %v1262_v16, %v1261_v32  ;;  %v458_v36 = vadd.f32 %v1955_v37, %v2013_v44  ;;  %v587_v55 = vmax.f32 %v473_v29, 0.0 }
 0x13c   : > { %v1506_v19 = vsel %vm1495_vm6, %v2161_v31, %v1505_v43  ;;  %v1269_v62 = vrot.slane %v1268_v7, 1  ;;  %v1276_v30 = vrot.slane %v1275_v49, 1  ;;  %v1282_v46 = vadd.f32 %v1281_v35, %v1280_v38 }
 0x13d   : > { %v1507_v59 = vsel %vm1497_vm7, %v2163_v8, %v1506_v19  ;;  %v613_v52 = vadd.f32 %v587_v55, %v585_v61  ;;  %v553_v48 = vadd.f32 %v2019_v60, %v1955_v37  ;;  %v468_v44 = vadd.f32 %v1955_v37, %v2021_v1 }
 0x13e   : > { %v1508_v58 = vsel %vm1499_vm8, %v2165_v14, %v1507_v59  ;;  %v1270_v31 = vadd.f32 %v1269_v62, %v1268_v7  ;;  %v1277_v28 = vadd.f32 %v1276_v30, %v1275_v49  ;;  %v1283_v22 = vrot.slane %v1282_v46, 1 }
 0x13f   : > { %v1509_v0 = vsel %vm1501_vm9, %v2168_v18, %v1508_v58  ;;  %v725_v40 = vcombine.high %v613_v52, %v613_v52  ;;  %v732_v8 = vrot.slane %v613_v52, %v1963_v53  ;;  %v603_v24 = vmax.f32 %v553_v48, 0.0 }
 0x140   : > { %1562 = vst.msk [vmem:[%s2101_s27 + $0x8] sm:$0xff] %vm1560_vm10, %v1509_v0  ;;  %v1284_v61 = vadd.f32 %v1283_v22, %v1282_v46  ;;  %v1531_v60 = vsel %vm1489_vm3, %v1270_v31, %v1263_v54  ;;  %v584_v3 = vmax.f32 %v458_v36, 0.0  ;;  %v586_v1 = vmax.f32 %v468_v44, 0.0 }
 0x141   : > { %v1532_v9 = vsel %vm1491_vm4, %v1277_v28, %v1531_v60  ;;  %v739_v14 = vrot.slane %v725_v40, %v1963_v53  ;;  %v740_v39 = vcombine.high %v732_v8, %v732_v8  ;;  %v1117_v63 = vsel %vm976_vm2, %v732_v8, 0.0 }
 0x142   : > { %v1533_v18 = vsel %vm1493_vm5, %v1284_v61, %v1532_v9  ;;  %v1118_v12 = vrot.slane %v1117_v63, 4  ;;  %v621_v23 = vadd.f32 %v603_v24, %v601_v4  ;;  %v612_v15 = vadd.f32 %v586_v1, %v584_v3 }
 0x143   : > { %v1534_v42 = vsel %vm1495_vm6, %v2170_v47, %v1533_v18  ;;  %v741_v5 = vcombine.high %v739_v14, %v739_v14  ;;  %v1124_v11 = vsel %vm976_vm2, %v740_v39, 0.0  ;;  %v1131_v32 = vsel %vm976_vm2, %v739_v14, 0.0 }
 0x144   : > { %v1535_v20 = vsel %vm1497_vm7, %v2179_v10, %v1534_v42  ;;  %v1119_v13 = vadd.f32 %v1118_v12, %v1117_v63  ;;  %v1125_v25 = vrot.slane %v1124_v11, 4  ;;  %v1132_v38 = vrot.slane %v1131_v32, 4 }
 0x145   : > { %v1536_v6 = vsel %vm1499_vm8, %v2181_v21, %v1535_v20  ;;  %v1138_v16 = vsel %vm976_vm2, %v741_v5, 0.0  ;;  %v861_v4 = vcombine.high %v621_v23, %v621_v23  ;;  %v868_v47 = vrot.slane %v621_v23, %v1963_v53 }
 0x146   : > { %v1537_v29 = vsel %vm1501_vm9, %v2189_v17, %v1536_v6  ;;  %v1120_v41 = vrot.slane %v1119_v13, 2  ;;  %v1126_v7 = vadd.f32 %v1125_v25, %v1124_v11  ;;  %v1133_v49 = vadd.f32 %v1132_v38, %v1131_v32 }
 0x147   : > { %1566 = vst.msk [vmem:[%s2101_s27 + $0x28] sm:$0xff] %vm1560_vm10, %v1537_v29  ;;  %v1139_v10 = vrot.slane %v1138_v16, 4  ;;  %v875_v35 = vrot.slane %v861_v4, %v1963_v53  ;;  %v876_v43 = vcombine.high %v868_v47, %v868_v47  ;;  %v1341_v54 = vsel %vm976_vm2, %v868_v47, 0.0 }
 0x148   : > { %v1121_v21 = vadd.f32 %v1120_v41, %v1119_v13  ;;  %v1127_v36 = vrot.slane %v1126_v7, 2  ;;  %v1134_v55 = vrot.slane %v1133_v49, 2  ;;  %v1342_v19 = vrot.slane %v1341_v54, 4 }
 0x149   : > { %v1140_v62 = vadd.f32 %v1139_v10, %v1138_v16  ;;  %v877_v30 = vcombine.high %v875_v35, %v875_v35  ;;  %v1348_v46 = vsel %vm976_vm2, %v876_v43, 0.0  ;;  %v1355_v17 = vsel %vm976_vm2, %v875_v35, 0.0 }
 0x14a   : > { %v1128_v59 = vadd.f32 %v1127_v36, %v1126_v7  ;;  %v1135_v52 = vadd.f32 %v1134_v55, %v1133_v49  ;;  %v1343_v48 = vadd.f32 %v1342_v19, %v1341_v54  ;;  %v1349_v58 = vrot.slane %v1348_v46, 4 }
 0x14b   : > { %v1141_v44 = vrot.slane %v1140_v62, 2  ;;  %v1356_v31 = vrot.slane %v1355_v17, 4  ;;  %v1362_v28 = vsel %vm976_vm2, %v877_v30, 0.0  ;;  %v538_v22 = vadd.f32 %v1955_v37, %v2015_v45 }
 0x14c   : > { %v1122_v0 = vrot.slane %v1121_v21, 1  ;;  %v1344_v40 = vrot.slane %v1343_v48, 2  ;;  %v548_v8 = vadd.f32 %v1955_v37, %v2023_v2  ;;  %v1350_v61 = vadd.f32 %v1349_v58, %v1348_v46 }
 0x14d   : > { %v1142_v24 = vadd.f32 %v1141_v44, %v1140_v62  ;;  %v1357_v60 = vadd.f32 %v1356_v31, %v1355_v17  ;;  %v1363_v3 = vrot.slane %v1362_v28, 4  ;;  %v1129_v1 = vrot.slane %v1128_v59, 1 }
 0x14e   : > { %v708_v9 = vcombine.high %v612_v15, %v612_v15  ;;  %v1136_v14 = vrot.slane %v1135_v52, 1  ;;  %v1351_v39 = vrot.slane %v1350_v61, 2  ;;  %v600_v18 = vmax.f32 %v538_v22, 0.0 }
 0x14f   : > { %v1364_v63 = vadd.f32 %v1363_v3, %v1362_v28  ;;  %v715_v12 = vrot.slane %v612_v15, %v1963_v53  ;;  %v602_v45 = vmax.f32 %v548_v8, 0.0  ;;  %v2246_v42 = vadd.f32 %v1122_v0, %v1121_v21 }
 0x150   : > { %v722_v23 = vrot.slane %v708_v9, %v1963_v53  ;;  %v1143_v5 = vrot.slane %v1142_v24, 1  ;;  %v2248_v11 = vadd.f32 %v1344_v40, %v1343_v48  ;;  %v1358_v2 = vrot.slane %v1357_v60, 2 }
 0x151   : > { %v2250_v32 = vadd.f32 %v1129_v1, %v1128_v59  ;;  %v723_v20 = vcombine.high %v715_v12, %v715_v12  ;;  %v1089_v25 = vsel %vm976_vm2, %v715_v12, 0.0  ;;  %v2253_v38 = vadd.f32 %v1136_v14, %v1135_v52 }
 0x152   : > { %v724_v13 = vcombine.high %v722_v23, %v722_v23  ;;  %v2255_v6 = vadd.f32 %v1351_v39, %v1350_v61  ;;  %v1365_v15 = vrot.slane %v1364_v63, 2  ;;  %v1090_v16 = vrot.slane %v1089_v25, 4 }
 0x153   : > { %v1096_v4 = vsel %vm976_vm2, %v723_v20, 0.0  ;;  %v1103_v47 = vsel %vm976_vm2, %v722_v23, 0.0  ;;  %v620_v41 = vadd.f32 %v602_v45, %v600_v18  ;;  %v2260_v7 = vadd.f32 %v1143_v5, %v1142_v24 }
 0x154   : > { %v1110_v29 = vsel %vm976_vm2, %v724_v13, 0.0  ;;  %v1346_v49 = vrot.slane %v2248_v11, 1  ;;  %v2263_v10 = vadd.f32 %v1358_v2, %v1357_v60  ;;  %v1091_v35 = vadd.f32 %v1090_v16, %v1089_v25 }
 0x155   : > { %v1097_v43 = vrot.slane %v1096_v4, 4  ;;  %v1104_v54 = vrot.slane %v1103_v47, 4  ;;  %v1111_v21 = vrot.slane %v1110_v29, 4  ;;  %v844_v36 = vcombine.high %v620_v41, %v620_v41 }
 0x156   : > { %v1353_v55 = vrot.slane %v2255_v6, 1  ;;  %v2266_v19 = vadd.f32 %v1365_v15, %v1364_v63  ;;  %v1092_v62 = vrot.slane %v1091_v35, 2  ;;  %v851_v30 = vrot.slane %v620_v41, %v1963_v53 }
 0x157   : > { %v1098_v46 = vadd.f32 %v1097_v43, %v1096_v4  ;;  %v1105_v17 = vadd.f32 %v1104_v54, %v1103_v47  ;;  %v1112_v59 = vadd.f32 %v1111_v21, %v1110_v29  ;;  %v858_v52 = vrot.slane %v844_v36, %v1963_v53 }
 0x158   : > { %v1093_v48 = vadd.f32 %v1092_v62, %v1091_v35  ;;  %v859_v44 = vcombine.high %v851_v30, %v851_v30  ;;  %v1313_v58 = vsel %vm976_vm2, %v851_v30, 0.0  ;;  %v2273_v31 = vadd.f32 %v2029_v26, %v1955_v37 }
 0x159   : > { %v1099_v28 = vrot.slane %v1098_v46, 2  ;;  %v1106_v22 = vrot.slane %v1105_v17, 2  ;;  %v1113_v0 = vrot.slane %v1112_v59, 2  ;;  %v860_v40 = vcombine.high %v858_v52, %v858_v52 }
 0x15a   : > { %v1094_v8 = vrot.slane %v1093_v48, 1  ;;  %v1314_v24 = vrot.slane %v1313_v58, 4  ;;  %v1320_v61 = vsel %vm976_vm2, %v859_v44, 0.0  ;;  %v1327_v60 = vsel %vm976_vm2, %v858_v52, 0.0 }
 0x15b   : > { %v1100_v3 = vadd.f32 %v1099_v28, %v1098_v46  ;;  %v1107_v1 = vadd.f32 %v1106_v22, %v1105_v17  ;;  %v1114_v9 = vadd.f32 %v1113_v0, %v1112_v59  ;;  %v1321_v14 = vrot.slane %v1320_v61, 4 }
 0x15c   : > { %v1095_v39 = vadd.f32 %v1094_v8, %v1093_v48  ;;  %v1315_v63 = vadd.f32 %v1314_v24, %v1313_v58  ;;  %v1328_v18 = vrot.slane %v1327_v60, 4  ;;  %v1334_v26 = vsel %vm976_vm2, %v860_v40, 0.0  ;;  %v2289_v48 = vld [vmem:[%s2420_s2] ss:$0 sm:$0xff] }
 0x15d   : > { %v1101_v12 = vrot.slane %v1100_v3, 1  ;;  %v1108_v23 = vrot.slane %v1107_v1, 1  ;;  %v1115_v45 = vrot.slane %v1114_v9, 1  ;;  %v1322_v5 = vadd.f32 %v1321_v14, %v1320_v61 }
 0x15e   : > { %v1316_v2 = vrot.slane %v1315_v63, 2  ;;  %v1329_v20 = vadd.f32 %v1328_v18, %v1327_v60  ;;  %v1335_v13 = vrot.slane %v1334_v26, 4  ;;  %v563_v25 = vadd.f32 %v2031_v27, %v1955_v37 }
 0x15f   : > { %v1102_v15 = vadd.f32 %v1101_v12, %v1100_v3  ;;  %v1109_v16 = vadd.f32 %v1108_v23, %v1107_v1  ;;  %v1116_v4 = vadd.f32 %v1115_v45, %v1114_v9  ;;  %v1323_v47 = vrot.slane %v1322_v5, 2 }
 0x160   : > { %v1360_v29 = vrot.slane %v2263_v10, 1  ;;  %v1317_v41 = vadd.f32 %v1316_v2, %v1315_v63  ;;  %v1330_v35 = vrot.slane %v1329_v20, 2  ;;  %v1336_v43 = vadd.f32 %v1335_v13, %v1334_v26 }
 0x161   : > { %v1367_v54 = vrot.slane %v2266_v19, 1  ;;  %v1510_v21 = vsel %vm1489_vm3, %v1102_v15, %v1095_v39  ;;  %v1324_v36 = vadd.f32 %v1323_v47, %v1322_v5  ;;  %v589_v62 = vmax.f32 %v2273_v31, 0.0 }
 0x162   : > { %v1511_v30 = vsel %vm1491_vm4, %v1109_v16, %v1510_v21  ;;  %v1318_v46 = vrot.slane %v1317_v41, 1  ;;  %v1331_v37 = vadd.f32 %v1330_v35, %v1329_v20  ;;  %v1337_v27 = vrot.slane %v1336_v43, 2 }
 0x163   : > { %v1512_v17 = vsel %vm1493_vm5, %v1116_v4, %v1511_v30  ;;  %v1325_v59 = vrot.slane %v1324_v36, 1  ;;  %v605_v52 = vmax.f32 %v563_v25, 0.0  ;;  %v478_v44 = vadd.f32 %v2289_v48, %v2039_v33 }
 0x164   : > { %v1513_v58 = vsel %vm1495_vm6, %v2246_v42, %v1512_v17  ;;  %v1319_v31 = vadd.f32 %v1318_v46, %v1317_v41  ;;  %v1332_v28 = vrot.slane %v1331_v37, 1  ;;  %v1338_v22 = vadd.f32 %v1337_v27, %v1336_v43 }
 0x165   : > { %v1514_v0 = vsel %vm1497_vm7, %v2250_v32, %v1513_v58  ;;  %v1326_v40 = vadd.f32 %v1325_v59, %v1324_v36  ;;  %v493_v8 = vadd.f32 %v2289_v48, %v2061_v50  ;;  %v573_v24 = vadd.f32 %v2289_v48, %v2063_v51 }
 0x166   : > { %v1515_v33 = vsel %vm1499_vm8, %v2253_v38, %v1514_v0  ;;  %v1333_v61 = vadd.f32 %v1332_v28, %v1331_v37  ;;  %v1339_v60 = vrot.slane %v1338_v22, 1  ;;  %v488_v42 = vadd.f32 %v2289_v48, %v2069_v56 }
 0x167   : > { %v1516_v3 = vsel %vm1501_vm9, %v2260_v7, %v1515_v33  ;;  %v1538_v32 = vsel %vm1489_vm3, %v1326_v40, %v1319_v31  ;;  %v591_v1 = vmax.f32 %v493_v8, 0.0  ;;  %v607_v9 = vmax.f32 %v573_v24, 0.0 }
 0x168   : > { %1563 = vst.msk [vmem:[%s2101_s27 + $0x10] sm:$0xff] %vm1560_vm10, %v1516_v3  ;;  %v1340_v50 = vadd.f32 %v1339_v60, %v1338_v22  ;;  %v1539_v51 = vsel %vm1491_vm4, %v1333_v61, %v1538_v32  ;;  %v588_v14 = vmax.f32 %v478_v44, 0.0  ;;  %v590_v39 = vmax.f32 %v488_v42, 0.0 }
 0x169   : > { %v1347_v38 = vadd.f32 %v1346_v49, %v2248_v11  ;;  %v615_v63 = vadd.f32 %v591_v1, %v589_v62  ;;  %v623_v56 = vadd.f32 %v607_v9, %v605_v52  ;;  %v1354_v7 = vadd.f32 %v1353_v55, %v2255_v6 }
 0x16a   : > { %v1361_v18 = vadd.f32 %v1360_v29, %v2263_v10  ;;  %v1540_v26 = vsel %vm1493_vm5, %v1340_v50, %v1539_v51  ;;  %v614_v12 = vadd.f32 %v590_v39, %v588_v14  ;;  %v1368_v11 = vadd.f32 %v1367_v54, %v2266_v19 }
 0x16b   : > { %v1541_v23 = vsel %vm1495_vm6, %v1347_v38, %v1540_v26  ;;  %v759_v45 = vcombine.high %v615_v63, %v615_v63  ;;  %v766_v5 = vrot.slane %v615_v63, %v1963_v53  ;;  %v895_v2 = vcombine.high %v623_v56, %v623_v56 }
 0x16c   : > { %v1542_v49 = vsel %vm1497_vm7, %v1354_v7, %v1541_v23  ;;  %v902_v20 = vrot.slane %v623_v56, %v1963_v53  ;;  %v558_v40 = vadd.f32 %v2289_v48, %v2041_v34  ;;  %v742_v8 = vcombine.high %v614_v12, %v614_v12 }
 0x16d   : > { %v1543_v6 = vsel %vm1499_vm8, %v1361_v18, %v1542_v49  ;;  %v773_v10 = vrot.slane %v759_v45, %v1963_v53  ;;  %v774_v55 = vcombine.high %v766_v5, %v766_v5  ;;  %v1173_v13 = vsel %vm976_vm2, %v766_v5, 0.0 }
 0x16e   : > { %v1544_v25 = vsel %vm1501_vm9, %v1368_v11, %v1543_v6  ;;  %v1174_v15 = vrot.slane %v1173_v13, 4  ;;  %v909_v16 = vrot.slane %v895_v2, %v1963_v53  ;;  %v910_v4 = vcombine.high %v902_v20, %v902_v20 }
 0x16f   : > { %1567 = vst.msk [vmem:[%s2101_s27 + $0x30] sm:$0xff] %vm1560_vm10, %v1544_v25  ;;  %v775_v19 = vcombine.high %v773_v10, %v773_v10  ;;  %v1180_v47 = vsel %vm976_vm2, %v774_v55, 0.0  ;;  %v1187_v29 = vsel %vm976_vm2, %v773_v10, 0.0  ;;  %v1397_v41 = vsel %vm976_vm2, %v902_v20, 0.0 }
 0x170   : > { %v1175_v35 = vadd.f32 %v1174_v15, %v1173_v13  ;;  %v1181_v43 = vrot.slane %v1180_v47, 4  ;;  %v1188_v54 = vrot.slane %v1187_v29, 4  ;;  %v911_v21 = vcombine.high %v909_v16, %v909_v16 }
 0x171   : > { %v1194_v36 = vsel %vm976_vm2, %v775_v19, 0.0  ;;  %v1398_v62 = vrot.slane %v1397_v41, 4  ;;  %v1404_v30 = vsel %vm976_vm2, %v910_v4, 0.0  ;;  %v1411_v46 = vsel %vm976_vm2, %v909_v16, 0.0 }
 0x172   : > { %v1176_v37 = vrot.slane %v1175_v35, 2  ;;  %v1182_v27 = vadd.f32 %v1181_v43, %v1180_v47  ;;  %v1189_v17 = vadd.f32 %v1188_v54, %v1187_v29  ;;  %v1195_v59 = vrot.slane %v1194_v36, 4 }
 0x173   : > { %v1399_v52 = vadd.f32 %v1398_v62, %v1397_v41  ;;  %v1405_v44 = vrot.slane %v1404_v30, 4  ;;  %v1412_v58 = vrot.slane %v1411_v46, 4  ;;  %v1418_v0 = vsel %vm976_vm2, %v911_v21, 0.0 }
 0x174   : > { %v1177_v31 = vadd.f32 %v1176_v37, %v1175_v35  ;;  %v1183_v28 = vrot.slane %v1182_v27, 2  ;;  %v1190_v22 = vrot.slane %v1189_v17, 2  ;;  %v568_v24 = vadd.f32 %v2289_v48, %v2071_v57 }
 0x175   : > { %v1196_v33 = vadd.f32 %v1195_v59, %v1194_v36  ;;  %v1400_v61 = vrot.slane %v1399_v52, 2  ;;  %v1406_v60 = vadd.f32 %v1405_v44, %v1404_v30  ;;  %v2342_v42 = vadd.f32 %v1412_v58, %v1411_v46 }
 0x176   : > { %v1419_v3 = vrot.slane %v1418_v0, 4  ;;  %v749_v32 = vrot.slane %v614_v12, %v1963_v53  ;;  %v1178_v1 = vrot.slane %v1177_v31, 1  ;;  %v2345_v9 = vadd.f32 %v1183_v28, %v1182_v27 }
 0x177   : > { %v2347_v50 = vadd.f32 %v1190_v22, %v1189_v17  ;;  %v604_v51 = vmax.f32 %v558_v40, 0.0  ;;  %v756_v34 = vrot.slane %v742_v8, %v1963_v53  ;;  %v606_v14 = vmax.f32 %v568_v24, 0.0 }
 0x178   : > { %v1197_v39 = vrot.slane %v1196_v33, 2  ;;  %v2350_v38 = vadd.f32 %v1400_v61, %v1399_v52  ;;  %v1407_v57 = vrot.slane %v1406_v60, 2  ;;  %v1414_v48 = vrot.slane %v2342_v42, 2 }
 0x179   : > { %v2353_v63 = vadd.f32 %v1419_v3, %v1418_v0  ;;  %v757_v56 = vcombine.high %v749_v32, %v749_v32  ;;  %v758_v7 = vcombine.high %v756_v34, %v756_v34  ;;  %v1145_v18 = vsel %vm976_vm2, %v749_v32, 0.0 }
 0x17a   : > { %v2356_v26 = vadd.f32 %v1178_v1, %v1177_v31  ;;  %v1185_v12 = vrot.slane %v2345_v9, 1  ;;  %v1192_v23 = vrot.slane %v2347_v50, 1  ;;  %v1146_v45 = vrot.slane %v1145_v18, 4 }
 0x17b   : > { %v1152_v5 = vsel %vm976_vm2, %v757_v56, 0.0  ;;  %v1159_v2 = vsel %vm976_vm2, %v756_v34, 0.0  ;;  %v1166_v11 = vsel %vm976_vm2, %v758_v7, 0.0  ;;  %v622_v49 = vadd.f32 %v606_v14, %v604_v51 }
 0x17c   : > { %v2363_v20 = vadd.f32 %v1197_v39, %v1196_v33  ;;  %v1147_v6 = vadd.f32 %v1146_v45, %v1145_v18  ;;  %v1153_v10 = vrot.slane %v1152_v5, 4  ;;  %v1160_v55 = vrot.slane %v1159_v2, 4 }
 0x17d   : > { %v1402_v13 = vrot.slane %v2350_v38, 1  ;;  %v1167_v25 = vrot.slane %v1166_v11, 4  ;;  %v878_v15 = vcombine.high %v622_v49, %v622_v49  ;;  %v885_v16 = vrot.slane %v622_v49, %v1963_v53 }
 0x17e   : > { %v2367_v4 = vadd.f32 %v1407_v57, %v1406_v60  ;;  %v1148_v19 = vrot.slane %v1147_v6, 2  ;;  %v1154_v47 = vadd.f32 %v1153_v10, %v1152_v5  ;;  %v1161_v29 = vadd.f32 %v1160_v55, %v1159_v2 }
 0x17f   : > { %v1168_v41 = vadd.f32 %v1167_v25, %v1166_v11  ;;  %v892_v35 = vrot.slane %v878_v15, %v1963_v53  ;;  %v893_v43 = vcombine.high %v885_v16, %v885_v16  ;;  %v1369_v54 = vsel %vm976_vm2, %v885_v16, 0.0 }
 0x180   : > { %v1149_v21 = vadd.f32 %v1148_v19, %v1147_v6  ;;  %v1155_v36 = vrot.slane %v1154_v47, 2  ;;  %v1162_v62 = vrot.slane %v1161_v29, 2  ;;  %v1370_v30 = vrot.slane %v1369_v54, 4 }
 0x181   : > { %v1169_v46 = vrot.slane %v1168_v41, 2  ;;  %v894_v37 = vcombine.high %v892_v35, %v892_v35  ;;  %v1376_v27 = vsel %vm976_vm2, %v893_v43, 0.0  ;;  %v1383_v17 = vsel %vm976_vm2, %v892_v35, 0.0 }
 0x182   : > { %v1150_v59 = vrot.slane %v1149_v21, 1  ;;  %v1156_v52 = vadd.f32 %v1155_v36, %v1154_v47  ;;  %v1163_v44 = vadd.f32 %v1162_v62, %v1161_v29  ;;  %v1371_v58 = vadd.f32 %v1370_v30, %v1369_v54 }
 0x183   : > { %v1170_v31 = vadd.f32 %v1169_v46, %v1168_v41  ;;  %v1377_v28 = vrot.slane %v1376_v27, 4  ;;  %v1384_v53 = vrot.slane %v1383_v17, 4  ;;  %v1390_v22 = vsel %vm976_vm2, %v894_v37, 0.0 }
 0x184   : > { %v1421_v0 = vrot.slane %v2353_v63, 2  ;;  %v1157_v40 = vrot.slane %v1156_v52, 1  ;;  %v1164_v8 = vrot.slane %v1163_v44, 1  ;;  %v1372_v24 = vrot.slane %v1371_v58, 2 }
 0x185   : > { %v1171_v33 = vrot.slane %v1170_v31, 1  ;;  %v1378_v61 = vadd.f32 %v1377_v28, %v1376_v27  ;;  %v1385_v60 = vadd.f32 %v1384_v53, %v1383_v17  ;;  %v1391_v3 = vrot.slane %v1390_v22, 4 }
 0x186   : > { %v1151_v32 = vadd.f32 %v1150_v59, %v1149_v21  ;;  %v1158_v1 = vadd.f32 %v1157_v40, %v1156_v52  ;;  %v1165_v51 = vadd.f32 %v1164_v8, %v1163_v44  ;;  %v1373_v34 = vadd.f32 %v1372_v24, %v1371_v58 }
 0x187   : > { %v1172_v14 = vadd.f32 %v1171_v33, %v1170_v31  ;;  %v1379_v39 = vrot.slane %v1378_v61, 2  ;;  %v1386_v57 = vrot.slane %v1385_v60, 2  ;;  %v1392_v56 = vadd.f32 %v1391_v3, %v1390_v22 }
 0x188   : > { %v1199_v7 = vrot.slane %v2363_v20, 1  ;;  %v1415_v18 = vadd.f32 %v1414_v48, %v2342_v42  ;;  %v1517_v45 = vsel %vm1489_vm3, %v1158_v1, %v1151_v32  ;;  %v1374_v5 = vrot.slane %v1373_v34, 1 }
 0x189   : > { %v1518_v2 = vsel %vm1491_vm4, %v1165_v51, %v1517_v45  ;;  %v1380_v11 = vadd.f32 %v1379_v39, %v1378_v61  ;;  %v1387_v49 = vadd.f32 %v1386_v57, %v1385_v60  ;;  %v1393_v6 = vrot.slane %v1392_v56, 2 }
 0x18a   : > { %v1186_v10 = vadd.f32 %v1185_v12, %v2345_v9  ;;  %v1193_v55 = vadd.f32 %v1192_v23, %v2347_v50  ;;  %v1422_v25 = vadd.f32 %v1421_v0, %v2353_v63  ;;  %v1519_v42 = vsel %vm1493_vm5, %v1172_v14, %v1518_v2 }
 0x18b   : > { %v1520_v48 = vsel %vm1495_vm6, %v2356_v26, %v1519_v42  ;;  %v1381_v15 = vrot.slane %v1380_v11, 1  ;;  %v1388_v16 = vrot.slane %v1387_v49, 1  ;;  %v1394_v19 = vadd.f32 %v1393_v6, %v1392_v56 }
 0x18c   : > { %v1200_v47 = vadd.f32 %v1199_v7, %v2363_v20  ;;  %v1409_v29 = vrot.slane %v2367_v4, 1  ;;  %v1521_v9 = vsel %vm1497_vm7, %v1186_v10, %v1520_v48  ;;  %v1375_v12 = vadd.f32 %v1374_v5, %v1373_v34 }
 0x18d   : > { %v1522_v50 = vsel %vm1499_vm8, %v1193_v55, %v1521_v9  ;;  %v1382_v23 = vadd.f32 %v1381_v15, %v1380_v11  ;;  %v1389_v63 = vadd.f32 %v1388_v16, %v1387_v49  ;;  %v1395_v41 = vrot.slane %v1394_v19, 1 }
 0x18e   : > { %v1416_v35 = vrot.slane %v1415_v18, 1  ;;  %v1523_v43 = vsel %vm1501_vm9, %v1200_v47, %v1522_v50  ;;  %v1423_v26 = vrot.slane %v1422_v25, 1  ;;  %v1403_v21 = vadd.f32 %v1402_v13, %v2350_v38 }
 0x18f   : > { %1564 = vst.msk [vmem:[%s2101_s27 + $0x18] sm:$0xff] %vm1560_vm10, %v1523_v43  ;;  %v1396_v54 = vadd.f32 %v1395_v41, %v1394_v19  ;;  %v1545_v20 = vsel %vm1489_vm3, %v1382_v23, %v1375_v12  ;;  %v1410_v62 = vadd.f32 %v1409_v29, %v2367_v4 }
 0x190   : > { %v1546_v36 = vsel %vm1491_vm4, %v1389_v63, %v1545_v20  ;;  %v1417_v46 = vadd.f32 %v1416_v35, %v1415_v18  ;;  %v1424_v27 = vadd.f32 %v1423_v26, %v1422_v25 }
 0x191   : > { %v1547_v30 = vsel %vm1493_vm5, %v1396_v54, %v1546_v36 }
 0x192   : > { %v1548_v37 = vsel %vm1495_vm6, %v1403_v21, %v1547_v30 }
 0x193   : > { %v1549_v17 = vsel %vm1497_vm7, %v1410_v62, %v1548_v37 }
 0x194   : > { %v1550_v59 = vsel %vm1499_vm8, %v1417_v46, %v1549_v17 }
 0x195   : > { %v1551_v52 = vsel %vm1501_vm9, %v1424_v27, %v1550_v59 }
 0x196   : > { %1568 = vst.msk [vmem:[%s2101_s27 + $0x38] sm:$0xff] %vm1560_vm10, %v1551_v52 }
 0x197 PF: > { %s13_s14 = sadd.s32 1, %s1836_s14   ;;  %s2424_s12 = smov %s1832_s13 }
 0x198   : > { %p10_p5 = scmp.ge.s32.totalorder %s13_s14, 4   ;;  %s2425_s13 = smov %s2427_s15 }
 0x19a   :  { %12 = sbr.rel (!%p10_p5) target bundleno = 2 (0x2), region = 62 }

</bundles_post_ra>
